<compile_context>
chip_gen: v7x
topology: tpu7x:2x2x1
jax: 0.10.0
libtpu: 0.0.40
codegen_flags: <defaults>
</compile_context>

<pallas_src>
import math
import numpy as np
import jax
import jax.numpy as jnp
from jax.experimental import pallas as pl
from jax.experimental.pallas import tpu as pltpu


def _rte_add_kernel(idx_ref, x_ref, bias_ref, o_ref):
    # idx_ref: SMEM (B*L,) int32 scalar-prefetch (consumed by the index_maps).
    # x_ref:   (1, r_tile, lane)  VMEM tile of the input.
    # bias_ref:(1, 1, lane)       type-selected, lane-packed bias row.
    # Sublane-broadcast add; lane-dense (unmasked) store.
    o_ref[...] = x_ref[...] + bias_ref[...]


def make_sinusoid_table(max_len, n_hid, dtype=jnp.float32):
    """Matches RelTemporalEncoding.__init__ embedding init (even n_hid)."""
    assert n_hid % 2 == 0
    position = jnp.arange(0.0, max_len, dtype=jnp.float32)[:, None]
    div_term = jnp.exp(jnp.arange(0, n_hid, 2, dtype=jnp.float32)
                       * -(math.log(10000.0) / n_hid))
    s = jnp.sin(position * div_term) / math.sqrt(n_hid)   # columns 0::2
    c = jnp.cos(position * div_term) / math.sqrt(n_hid)   # columns 1::2
    table = jnp.stack([s, c], axis=-1).reshape(max_len, n_hid)
    return table.astype(dtype)


def rte_forward(x, dts, emb_table, w_lin, b_lin, *, rte_ratio=2, r_tile=None):
    """x: (B, L, H, W, C); dts: (B, L) ints; w_lin: (C, C); b_lin: (C,)."""
    B, L, H, W, C = x.shape
    HW = H * W
    N = B * L
    max_len = emb_table.shape[0]

    # Pack `d` consecutive spatial positions into the lane dim so the last
    # block dim is a 128-lane multiple (lane-dense loads/stores).
    d = 1
    for lane_target in (128, 256, 512):
        if lane_target % C == 0 and HW % (lane_target // C) == 0:
            d = lane_target // C
            break
    rows = HW // d
    lane = d * C

    # lin() applied once to the whole (tiny) table == lin(emb(t)) per lookup.
    proj = jnp.dot(emb_table.astype(jnp.float32), w_lin.T) + b_lin   # (max_len, C)
    proj_tiled = jnp.tile(proj, (1, d)).reshape(max_len, 1, lane)

    idx = dts.reshape(N).astype(jnp.int32) * rte_ratio               # (B*L,)

    x2 = x.astype(jnp.float32).reshape(N, rows, lane)

    if r_tile is None:
        r_tile = rows
        # Keep each buffer <= ~2 MiB so double-buffered in/out fit easily in
        # scoped VMEM on every generation (v7x has only 64 MiB total).
        while r_tile * lane * 4 > (2 << 20) and r_tile % 16 == 0:
            r_tile //= 2
    assert rows % r_tile == 0
    assert r_tile == rows or r_tile % 8 == 0

    grid = (N, rows // r_tile)   # both parallel: B*L >= 2 keeps megacore busy

    out = pl.pallas_call(
        _rte_add_kernel,
        out_shape=jax.ShapeDtypeStruct((N, rows, lane), jnp.float32),
        grid_spec=pltpu.PrefetchScalarGridSpec(
            num_scalar_prefetch=1,
            grid=grid,
            in_specs=[
                pl.BlockSpec((1, r_tile, lane),
                             lambda n, r, idx_ref: (n, r, 0)),
                # bias row gathered by the prefetched dts index -> one small
                # (1, 1, lane) DMA per grid step, no per-batch weight copies.
                pl.BlockSpec((1, 1, lane),
                             lambda n, r, idx_ref: (idx_ref[n], 0, 0)),
            ],
            out_specs=pl.BlockSpec((1, r_tile, lane),
                                   lambda n, r, idx_ref: (n, r, 0)),
        ),
        compiler_params=pltpu.CompilerParams(
            dimension_semantics=("parallel", "parallel"),
            vmem_limit_bytes=32 * 1024 * 1024,
        ),
    )(idx, x2, proj_tiled)

    return out.reshape(B, L, H, W, C)


def reference(x, dts, emb_table, w_lin, b_lin, *, rte_ratio=2):
    """Pure-JAX transliteration of RTE.forward (eval mode)."""
    idx = dts.astype(jnp.int32) * rte_ratio                          # (B, L)
    emb = emb_table[idx]                                             # (B, L, C)
    bias = jnp.dot(emb, w_lin.T) + b_lin                             # (B, L, C)
    return x + bias[:, :, None, None, :]


if __name__ == "__main__":
    B, L, H, W, C = 2, 3, 8, 8, 32
    rte_ratio, max_len = 2, 100

    key = jax.random.PRNGKey(0)
    k1, k2, k3, k4 = jax.random.split(key, 4)

    x = jax.random.normal(k1, (B, L, H, W, C), dtype=jnp.float32)
    dts = jax.random.randint(k2, (B, L), 0, max_len // rte_ratio,
                             dtype=jnp.int32)
    w_lin = jax.random.normal(k3, (C, C), dtype=jnp.float32) * 0.1
    b_lin = jax.random.normal(k4, (C,), dtype=jnp.float32) * 0.1
    emb_table = make_sinusoid_table(max_len, C)

    out = rte_forward(x, dts, emb_table, w_lin, b_lin, rte_ratio=rte_ratio)
    out = jax.block_until_ready(out)

    ref = reference(x, dts, emb_table, w_lin, b_lin, rte_ratio=rte_ratio)
    assert out.shape == (B, L, H, W, C)
    np.testing.assert_allclose(np.asarray(out), np.asarray(ref),
                               rtol=1e-4, atol=1e-5)
    print("KERNEL_OK")
</pallas_src>

<mosaic_0001>
module attributes {stable_mosaic.version = 11 : i64} {
  func.func @_rte_add_kernel(%arg0: i32, %arg1: i32, %arg2: memref<6xi32, #tpu.memory_space<smem>>, %arg3: memref<1x16x128xf32, #tpu.memory_space<vmem>>, %arg4: memref<1x1x128xf32, #tpu.memory_space<vmem>>, %arg5: memref<1x16x128xf32, #tpu.memory_space<vmem>>) attributes {dimension_semantics = [#tpu.dimension_semantics<parallel>, #tpu.dimension_semantics<parallel>], iteration_bounds = array<i64: 6, 1>, scalar_prefetch = 1 : i64, scratch_operands = 0 : i64, tpu.core_type = #tpu.core_type<tc>, window_params = [{transform_indices = @transform_0, window_bounds = array<i64: 1, 16, 128>}, {transform_indices = @transform_1, window_bounds = array<i64: 1, 1, 128>}, {transform_indices = @transform_2, window_bounds = array<i64: 1, 16, 128>}]} {
    %c0 = arith.constant 0 : index
    %c0_0 = arith.constant 0 : index
    %c0_1 = arith.constant 0 : index
    %0 = vector.load %arg3[%c0, %c0_0, %c0_1] : memref<1x16x128xf32, #tpu.memory_space<vmem>>, vector<1x16x128xf32>
    %c0_2 = arith.constant 0 : index
    %c0_3 = arith.constant 0 : index
    %c0_4 = arith.constant 0 : index
    %1 = vector.load %arg4[%c0_2, %c0_3, %c0_4] : memref<1x1x128xf32, #tpu.memory_space<vmem>>, vector<1x1x128xf32>
    %2 = vector.broadcast %1 : vector<1x1x128xf32> to vector<1x16x128xf32>
    %3 = arith.addf %0, %2 : vector<1x16x128xf32>
    %c0_5 = arith.constant 0 : index
    %c0_6 = arith.constant 0 : index
    %c0_7 = arith.constant 0 : index
    %4 = vector.load %arg5[%c0_5, %c0_6, %c0_7] : memref<1x16x128xf32, #tpu.memory_space<vmem>>, vector<1x16x128xf32>
    tpu.vector_store %arg5[%c0_5, %c0_6, %c0_7], %3 {strides = array<i32>} : memref<1x16x128xf32, #tpu.memory_space<vmem>>, vector<1x16x128xf32>,
    return
  }
  func.func @transform_0(%arg0: i32, %arg1: i32, %arg2: memref<6xi32, #tpu.memory_space<smem>>) -> (i32, i32, i32) {
    %c0_i32 = arith.constant 0 : i32
    %c0_i32_0 = arith.constant 0 : i32
    return %arg0, %arg1, %c0_i32 : i32, i32, i32
  }
  func.func @transform_1(%arg0: i32, %arg1: i32, %arg2: memref<6xi32, #tpu.memory_space<smem>>) -> (i32, i32, i32) {
    %0 = arith.index_cast %arg0 : i32 to index
    %1 = memref.load %arg2[%0] : memref<6xi32, #tpu.memory_space<smem>>
    %c0_i32 = arith.constant 0 : i32
    %c0_i32_0 = arith.constant 0 : i32
    %c0_i32_1 = arith.constant 0 : i32
    return %1, %c0_i32, %c0_i32_0 : i32, i32, i32
  }
  func.func @transform_2(%arg0: i32, %arg1: i32, %arg2: memref<6xi32, #tpu.memory_space<smem>>) -> (i32, i32, i32) {
    %c0_i32 = arith.constant 0 : i32
    %c0_i32_0 = arith.constant 0 : i32
    return %arg0, %arg1, %c0_i32 : i32, i32, i32
  }
}

</mosaic_0001>

<bundles_post_ra>
// kernel: tpu_custom_call.1
= control target key start
LH: loop header
LB: loop body
LE: loop exit
PB: predicated region body
PF: predicated region fallthrough
CT: control target
= control target key end

     0   :  { %s987_s0 = inlined_call_operand.hbm [shape: s32[6], index: 0, kind: input, shape index: {}]   ;;  %s988_s1 = inlined_call_operand.hbm [shape: f32[6,16,128], index: 1, kind: input, shape index: {}]   ;;  %s989_s2 = inlined_call_operand.hbm [shape: f32[100,1,128], index: 2, kind: input, shape index: {}]   ;;  %s990_s3 = inlined_call_operand.hbm [shape: f32[6,16,128], index: 3, kind: output, shape index: {}]  }
   0x1   :  { %997 = sst [smem:[#allocation16_spill]] %s988_s1  ;;  %s480_s14 = scalar_lea.hbm %s987_s0, 16 }
   0x2   :  { %p481_p0 = scmp.ne.s32.totalorder %s987_s0, %s480_s14  ;;  %p484_p1 = scmp.lt.u32.totalorder %s480_s14, %s987_s0 }
   0x4   :  { %p486_p2 = pnand %p484_p1, %p481_p0 }
   0x6   :  { %489 = shalt.err (!%p486_p2)  }
   0x7   :  { %s664_s19 = smov [#allocation3]  }
   0x8   :  { %9 = dma.hbm_to_smem %s987_s0, 16, %s664_s19, [#allocation2] }
   0x9   :  { %614 = dma.done.wait [#allocation2], 16 }
   0xa   :  { %615 = vsyncadd [#allocation2], 4294967280 }
   0xb   :  { %11 = sfence }
   0xc   :  { %12 = vsyncpa [#allocation5], 0 }
   0xd   :  { %14 = vsyncpa [#allocation5 + $0x1], 0 }
   0xe   :  { %15 = vsyncpa [#allocation8], 0 }
   0xf   :  { %17 = vsyncpa [#allocation8 + $0x1], 0 }
  0x10   :  { %18 = vsyncpa [#allocation6], 0 }
  0x11   :  { %20 = vsyncpa [#allocation6 + $0x1], 0  ;;  %s704_s22 = smov 0   ;;  %s706_s23 = smov 0  }
  0x12   :  { %s708_s24 = smov 0   ;;  %s710_s25 = smov 0  }
  0x13   :  { %s712_s26 = smov 0   ;;  %s714_s0 = smov 0  }
  0x14   :  { %s716_s27 = smov 0   ;;  %s718_s28 = smov 0  }
  0x15   :  { %s720_s29 = smov 0  }
  0x16 LB: > { %s361_s30 = sadd.s32 4294967295, %s662_s29   ;;  %s362_s4 = sadd.s32 4294967294, %s662_s29   ;;  %s662_s29 = sphi %s720_s29, %s26_s29   ;;  %s658_s28 = sphi %s718_s28, %s1023_s28   ;;  %s654_s27 = sphi %s716_s27, %s1022_s27   ;;  %s650_s0 = sphi %s714_s0, %s1021_s0   ;;  %s646_s26 = sphi %s712_s26, %s1020_s26   ;;  %s642_s25 = sphi %s710_s25, %s1019_s25   ;;  %s638_s24 = sphi %s708_s24, %s1018_s24   ;;  %s634_s23 = sphi %s706_s23, %s1017_s23   ;;  %s630_s22 = sphi %s704_s22, %s1016_s22  }
  0x17   : > { %s38_s5 = sadd.s32 1, %s658_s28  ;;  %s47_s6 = sadd.s32 1, %s650_s0 }
  0x18   : > { %p40_p3 = scmp.ge.s32.totalorder %s38_s5, 6  ;;  %p54_p4 = scmp.ne.s32.totalorder %s650_s0, %s646_s26 }
  0x19   : > { %p992_p5 = scmp.eq.s32.totalorder %s662_s29, 0  ;;  %p993_p6 = scmp.ne.s32.totalorder %s646_s26, %s642_s25 }
  0x1a   : > { %s1025_s5 = smov (%p40_p3, %s38_s5), 0  ;;  %s767_s8 = sld [smem:[#allocation3 + %s658_s28]] }
  0x1b   : > { %p762_p7 = por %p992_p5, %p54_p4  ;;  %s42_s9 = ssub.s32 %s658_s28, %s1025_s5 }
  0x1c   : > { %p114_p8 = scmp.eq.s32.totalorder %s361_s30, 5  ;;  %p45_p9 = scmp.eq.s32.totalorder %s42_s9, 0 }
  0x1d   : > { %p120_p10 = scmp.eq.s32.totalorder %s362_s4, 5  ;;  %p991_p13 = scmp.lt.s32.totalorder %s662_s29, 6 }
  0x1e   : > { %p773_p11 = por %p114_p8, %p54_p4  ;;  %s140_s13 = sand.u32 1, %s650_s0  }
  0x1f   : > { %s778_s11 = scalar_select %p45_p9, %s650_s0, %s47_s6  }
  0x20   : > { %s999_s10 = scalar_select %p773_p11, 1, 0 }
  0x21   : > { %p783_p12 = por %p120_p10, %p993_p6  ;;  %s378_s14 = sshll.u32 %s658_s28, 8 }
  0x22   : > { %s365_s15 = sshll.u32 %s140_s13, 4  ;;  %s1001_s1 = sld [smem:[#allocation16_spill]] }
  0x23   : > { %s1000_s12 = scalar_select %p783_p12, 1, 0 }
  0x24   : > { %s144_s19 = scalar_lea.vmem [#allocation4], %s365_s15  ;;  %p799_p0 = pnand %p991_p13, %p762_p7 }
  0x25   : > { %s153_s20 = sshll.u32 %s144_s19, 4  ;;  %s805_s4 = scalar_lea.sflag [#allocation5], %s140_s13  ;;  %s803_s20 = int_to_ptr.vmem [resolvable:$true] %s153_s20 }
  0x26   : > { %p492_p2 = pneg %p799_p0 }
  0x28   : > { %s793_s18 = scalar_lea.hbm %s1001_s1, %s378_s14  ;;  %s495_s14 = scalar_lea.hbm %s1001_s1, 1536 }
  0x29   : > { %s490_s6 = scalar_lea.hbm %s793_s18, 256  ;;  %p496_p7 = scmp.lt.u32.totalorder %s793_s18, %s1001_s1 }
  0x2a   : > { %p491_p1 = scmp.ne.s32.totalorder %s793_s18, %s490_s6  ;;  %p497_p8 = scmp.lt.u32.totalorder %s495_s14, %s490_s6 }
  0x2b   : > { %p499_p10 = scmp.lt.u32.totalorder %s490_s6, %s793_s18 }
  0x2c   : > { %p493_p3 = pnand %p492_p2, %p491_p1  ;;  %p498_p9 = por %p497_p8, %p496_p7 }
  0x2e   : > { %p494_p4 = pneg %p493_p3  ;;  %p500_p13 = por %p499_p10, %p498_p9 }
  0x30   : > { %p501_p5 = pnand %p500_p13, %p494_p4 }
  0x32   : > { %504 = shalt.err (!%p501_p5)
}
  0x33   : > { %s505_s13 = scalar_lea.vmem %s803_s20, 256  ;;  %s665_s17 = smov [#allocation4]  }
  0x34   : > { %p506_p1 = scmp.ne.s32.totalorder %s803_s20, %s505_s13  ;;  %s510_s19 = sshll.u32 %s665_s17, 4  ;;  %s511_s19 = int_to_ptr.vmem [resolvable:$false] %s510_s19 }
  0x35   : > { %s512_s7 = scalar_lea.vmem %s511_s19, 512  ;;  %p513_p12 = scmp.lt.s32.totalorder %s803_s20, %s511_s19 }
  0x36   : > { %p508_p3 = pnand %p506_p1, %p492_p2  ;;  %p514_p7 = scmp.lt.s32.totalorder %s512_s7, %s505_s13 }
  0x38   : > { %p509_p6 = pneg %p508_p3  ;;  %p515_p8 = por %p514_p7, %p513_p12 }
  0x3a   : > { %p516_p9 = pnand %p515_p8, %p509_p6 }
  0x3c   : > { %519 = shalt.err (!%p516_p9)
}
  0x3d   : > { %s666_s6 = smov 128   ;;  %s667_s9 = smov 8  }
  0x3e   : > { %391 = dma.hbm_to_vmem [thread:$0]  (!%p799_p0), %s793_s18, 256, %s803_s20, %s805_s4, %s666_s6, %s666_s6, %s667_s9  }
  0x3f   : > { %p369_p5 = scmp.ge.s32.totalorder %s662_s29, 1  ;;  %p179_p6 = scmp.lt.s32.totalorder %s662_s29, 7 }
  0x40   : > { %p61_p13 = scmp.eq.s32.totalorder %s361_s30, 0  ;;  %s71_s15 = sld [smem:[#allocation3 + %s1025_s5]] }
  0x41   : > { %p835_p12 = pnand %p369_p5, %p179_p6  ;;  %p1004_p2 = scmp.ne.s32.totalorder %s646_s26, %s642_s25 }
  0x42   : > { %p82_p0 = scmp.ne.s32.totalorder %s638_s24, %s634_s23  ;;  %p88_p10 = scmp.ne.s32.totalorder %s634_s23, %s630_s22 }
  0x43   : > { %p845_p4 = por %p61_p13, %p1004_p2  ;;  %p1006_p1 = scmp.eq.s32.totalorder %s662_s29, 0 }
  0x44   : > { %p855_p7 = por %p88_p10, %p61_p13  ;;  %s75_s4 = sadd.s32 1, %s638_s24 }
  0x45   : > { %s1005_s16 = scalar_select %p845_p4, 1, 0 }
  0x46   : > { %p84_p3 = por %p82_p0, %p1006_p1  ;;  %s72_s21 = ssub.s32 %s767_s8, %s71_s15 }
  0x47   : > { %s1007_s18 = scalar_select %p855_p7, 1, 0 }
  0x48   : > { %s381_s20 = scalar_select %p84_p3, [#allocation3], [#allocation10] }
  0x49   : > { %p73_p8 = scmp.eq.s32.totalorder %s72_s21, 0  ;;  %s163_s30 = sand.u32 1, %s638_s24  }
  0x4a   : > { %s382_s13 = scalar_select %p84_p3, %s658_s28, 0 }
  0x4b   : > { %s864_s17 = scalar_select %p73_p8, %s638_s24, %s75_s4  }
  0x4c   : > { %p1008_p9 = scmp.lt.s32.totalorder %s662_s29, 6  ;;  %s166_s7 = scalar_lea.vmem [#allocation7], %s163_s30 }
  0x4d   : > { %s174_s8 = sshll.u32 %s166_s7, 4  ;;  %s164_s4 = scalar_lea.sflag [#allocation8], %s163_s30  ;;  %s876_s8 = int_to_ptr.vmem [resolvable:$true] %s174_s8 }
  0x4e   : > { %s1027_s20 = smov (!%p1008_p9, %s381_s20), [#allocation11]  ;;  %p1009_p5 = pmov %p1008_p9 }
  0x50   : > { %s1029_s13 = smov (!%p1009_p5, %s382_s13), 0  ;;  %p1010_p6 = pmov %p1009_p5 }
  0x51   : > { %s167_s19 = sld [smem:[%s1027_s20 + %s1029_s13]] }
  0x52   : > { %p872_p2 = pnand %p1010_p6, %p84_p3 }
  0x54   : > { %p522_p0 = pneg %p872_p2 }
  0x57   : > { %s368_s6 = sshll.u32 %s167_s19, 4  ;;  %s525_s19 = scalar_lea.hbm %s989_s2, 1600 }
  0x58   : > { %s881_s21 = scalar_lea.hbm %s989_s2, %s368_s6 }
  0x59   : > { %s520_s1 = scalar_lea.hbm %s881_s21, 16  ;;  %p526_p3 = scmp.lt.u32.totalorder %s881_s21, %s989_s2 }
  0x5a   : > { %p521_p13 = scmp.ne.s32.totalorder %s881_s21, %s520_s1  ;;  %p527_p8 = scmp.lt.u32.totalorder %s525_s19, %s520_s1 }
  0x5b   : > { %p529_p5 = scmp.lt.u32.totalorder %s520_s1, %s881_s21 }
  0x5c   : > { %p523_p10 = pnand %p522_p0, %p521_p13  ;;  %p528_p9 = por %p527_p8, %p526_p3 }
  0x5e   : > { %p524_p1 = pneg %p523_p10  ;;  %p530_p6 = por %p529_p5, %p528_p9 }
  0x60   : > { %p531_p11 = pnand %p530_p6, %p524_p1 }
  0x62   : > { %534 = shalt.err (!%p531_p11)
}
  0x63   : > { %s535_s30 = scalar_lea.vmem %s876_s8, 16  ;;  %s668_s9 = smov [#allocation7]  }
  0x64   : > { %p536_p13 = scmp.ne.s32.totalorder %s876_s8, %s535_s30  ;;  %s540_s15 = sshll.u32 %s668_s9, 4  ;;  %s541_s15 = int_to_ptr.vmem [resolvable:$false] %s540_s15 }
  0x65   : > { %s542_s20 = scalar_lea.vmem %s541_s15, 32  ;;  %p543_p4 = scmp.lt.s32.totalorder %s876_s8, %s541_s15 }
  0x66   : > { %p538_p10 = pnand %p536_p13, %p522_p0  ;;  %p544_p3 = scmp.lt.s32.totalorder %s542_s20, %s535_s30 }
  0x68   : > { %p539_p7 = pneg %p538_p10  ;;  %p545_p8 = por %p544_p3, %p543_p4 }
  0x6a   : > { %p546_p9 = pnand %p545_p8, %p539_p7 }
  0x6c   : > { %549 = shalt.err (!%p546_p9)
}
  0x6d   : > { %396 = dma.hbm_to_vmem [thread:$0]  (!%p872_p2), %s881_s21, 16, %s876_s8, %s164_s4  }
  0x6e   : > { %183 = sbr.rel (%p835_p12) target bundleno = 148 (0x94), region = 28  ;;  %s911_s1 = sand.u32 (!%p835_p12), 1, %s646_s26  }
  0x6f   : > { %s370_s13 = sshll.u32 (!%p835_p12), %s911_s1, 4  ;;  %s186_s19 = scalar_lea.sflag (!%p835_p12), [#allocation5], %s911_s1 }
  0x70   : > { %s189_s7 = scalar_lea.vmem (!%p835_p12), [#allocation4], %s370_s13  ;;  %p1012_p11 = scmp.ne.s32.totalorder (!%p835_p12), %s1005_s16, 0 }
  0x75   : > { %617 = dma.done.wait (%p1012_p11), %s186_s19, 256  }
  0x76   : > { %619 = vsyncadd (%p1012_p11), %s186_s19, 4294967040  ;;  %s194_s22 = sand.u32 1, %s634_s23   ;;  %p1013_p12 = scmp.ne.s32.totalorder %s1007_s18, 0 }
  0x77   : > { %s195_s8 = scalar_lea.sflag [#allocation8], %s194_s22  ;;  %s197_s14 = scalar_lea.vmem [#allocation7], %s194_s22 }
  0x78   : > { %621 = dma.done.wait (%p1013_p12), %s195_s8, 16  }
  0x79   : > { %623 = vsyncadd (%p1013_p12), %s195_s8, 4294967280  ;;  %s221_s21 = scalar_lea.vmem [#allocation9], %s370_s13  ;;  %s379_s6 = sshll.u32 %s654_s27, 8  ;;  %v225_v0 = vld [vmem:[%s189_s7] sm:$0xff]  ;;  %v226_v2 = vld [vmem:[%s189_s7 + $0x8] sm:$0xff] }
  0x7a   : > { %s254_s4 = sshll.u32 %s221_s21, 4  ;;  %v372_v1 = vld [vmem:[%s197_s14] ss:$0 sm:$0xff]  ;;  %s930_s9 = scalar_lea.hbm %s990_s3, %s379_s6  ;;  %s925_s4 = int_to_ptr.vmem [resolvable:$true] %s254_s4 }
  0x7b   : > { %v234_v3 = vadd.f32 %v372_v1, %v225_v0  ;;  %v235_v4 = vadd.f32 %v372_v1, %v226_v2  ;;  %s239_s18 = scalar_lea.sflag [#allocation6], %s911_s1  ;;  %s550_s15 = scalar_lea.vmem %s925_s4, 256 }
  0x7c   : > { %p551_p4 = scmp.ne.s32.totalorder %s925_s4, %s550_s15  ;;  %p1014_p7 = scmp.ne.s32.totalorder %s999_s10, 0 }
  0x7d   : > { %236 = vst [vmem:[%s221_s21] sm:$0xff] %v234_v3  ;;  %237 = vst [vmem:[%s221_s21 + $0x8] sm:$0xff] %v235_v4  ;;  %s669_s27 = smov [#allocation9]  }
  0x7e   : > { %p552_p2 = pnand %p551_p4, %p1014_p7  ;;  %s554_s20 = sshll.u32 %s669_s27, 4  ;;  %s555_s20 = int_to_ptr.vmem [resolvable:$false] %s554_s20 }
  0x7f   : > { %s556_s13 = scalar_lea.vmem %s555_s20, 512  ;;  %p557_p1 = scmp.lt.s32.totalorder %s925_s4, %s555_s20 }
  0x80   : > { %p553_p0 = pneg %p552_p2  ;;  %p558_p5 = scmp.lt.s32.totalorder %s556_s13, %s550_s15 }
  0x82   : > { %p559_p6 = por %p558_p5, %p557_p1 }
  0x84   : > { %p560_p13 = pnand %p559_p6, %p553_p0 }
  0x86   : > { %563 = shalt.err (!%p560_p13)
}
  0x87   : > { %s564_s19 = scalar_lea.hbm %s930_s9, 256  ;;  %s568_s8 = scalar_lea.hbm %s990_s3, 1536 }
  0x88   : > { %p565_p10 = scmp.ne.s32.totalorder %s930_s9, %s564_s19  ;;  %p569_p9 = scmp.lt.u32.totalorder %s930_s9, %s990_s3 }
  0x89   : > { %p570_p11 = scmp.lt.u32.totalorder %s568_s8, %s564_s19  ;;  %p572_p4 = scmp.lt.u32.totalorder %s564_s19, %s930_s9 }
  0x8a   : > { %p566_p3 = pnand %p565_p10, %p1014_p7 }
  0x8b   : > { %p571_p12 = por %p570_p11, %p569_p9 }
  0x8c   : > { %p567_p8 = pneg %p566_p3 }
  0x8d   : > { %p573_p2 = por %p572_p4, %p571_p12 }
  0x8f   : > { %p574_p0 = pnand %p573_p2, %p567_p8 }
  0x91   : > { %577 = shalt.err (!%p574_p0)
}
  0x92   : > { %s670_s6 = smov 128   ;;  %s671_s16 = smov 8  }
  0x93   : > { %386 = dma.vmem_to_hbm [thread:$0]  (%p1014_p7), %s925_s4, 256, %s930_s9, %s239_s18, %s670_s6, %s670_s6, %s671_s16  }
  0x94 PF: > { %p402_p1 = scmp.ge.s32.totalorder %s662_s29, 2  ;;  %s269_s30 = sand.u32 1, %s642_s25  }
  0x95   : > { %p1015_p5 = scmp.ne.s32.totalorder %s1000_s12, 0  ;;  %s270_s15 = scalar_lea.sflag [#allocation6], %s269_s30 }
  0x97   : > { %p398_p6 = pnand %p402_p1, %p1015_p5 }
  0x99   : > { %625 = dma.done.wait (!%p398_p6), %s270_s15, 256  }
  0x9a   : > { %627 = vsyncadd (!%p398_p6), %s270_s15, 4294967040  ;;  %s26_s29 = sadd.s32 1, %s662_s29   ;;  %s1016_s22 = smov %s634_s23 }
  0x9b   : > { %p23_p13 = scmp.ge.s32.totalorder %s26_s29, 8   ;;  %s1017_s23 = smov %s638_s24 }
  0x9c   : > { %s1018_s24 = smov %s864_s17  ;;  %s1019_s25 = smov %s646_s26 }
  0x9d   : > { %s1020_s26 = smov %s650_s0  ;;  %s1021_s0 = smov %s778_s11 }
  0x9e   : > { %s1022_s27 = smov %s658_s28  ;;  %s1023_s28 = smov %s1025_s5 }
  0x9f   :  { %25 = sbr.rel (!%p23_p13) target bundleno = 22 (0x16), region = 86 }
  0xa6   :  { %275 = vsyncpa [#allocation5], 1 }
  0xa7   :  { %277 = vsyncpa [#allocation5 + $0x1], 1 }
  0xa8   :  { %278 = vsyncpa [#allocation8], 1 }
  0xa9   :  { %280 = vsyncpa [#allocation8 + $0x1], 1 }
  0xaa   :  { %281 = vsyncpa [#allocation6], 1 }
  0xab   :  { %283 = vsyncpa [#allocation6 + $0x1], 1 }

</bundles_post_ra>
